<compile_context>
chip_gen: v7x
topology: tpu7x:2x2x1
jax: 0.10.0
libtpu: 0.0.40
codegen_flags: <defaults>
</compile_context>

<pallas_src>
import math

import jax
import jax.numpy as jnp
from jax import lax
from jax.experimental import pallas as pl
from jax.experimental.pallas import tpu as pltpu


# ----------------------------- kernel ---------------------------------------

def _contrastive_kernel(x_ref, pe_ref, w0_ref, b0_ref, w1_ref, b1_ref,
                        w2_ref, b2_ref, out_ref, acc_ref):
    k = pl.program_id(1)

    @pl.when(k == 0)
    def _():
        acc_ref[...] = jnp.zeros_like(acc_ref)

    # Backbone matmul, K-streamed: f32 x tile cast to bf16 on the VPU right
    # before the MXU; f32 accumulation in VMEM scratch.
    acc_ref[...] += jnp.dot(x_ref[...].astype(jnp.bfloat16), w0_ref[...],
                            preferred_element_type=jnp.float32)

    @pl.when(k == pl.num_programs(1) - 1)
    def _():
        # Backbone bias + ReLU, then positional-encoding add (f32).
        h = jnp.maximum(acc_ref[...] + b0_ref[...], 0.0) + pe_ref[...]

        # Contrastive MLP head: Linear -> ReLU -> Linear (bf16 MXU, f32 acc).
        z = jnp.dot(h.astype(jnp.bfloat16), w1_ref[...],
                    preferred_element_type=jnp.float32) + b1_ref[...]
        z = jnp.maximum(z, 0.0)
        f = jnp.dot(z.astype(jnp.bfloat16), w2_ref[...],
                    preferred_element_type=jnp.float32) + b2_ref[...]

        # F.normalize(dim=1): f / max(||f||, 1e-12) == f * rsqrt(max(ss, 1e-24)).
        ss = jnp.sum(f * f, axis=1, keepdims=True)
        out_ref[...] = (f * lax.rsqrt(jnp.maximum(ss, 1e-24))).astype(out_ref.dtype)


# ----------------------------- helpers ---------------------------------------

def _round_up(x, m):
    return ((x + m - 1) // m) * m


def _pad_to(a, shape):
    widths = [(0, t - s) for s, t in zip(a.shape, shape)]
    if all(w == (0, 0) for w in widths):
        return a
    return jnp.pad(a, widths)


# Tile-budget constants (conservative across v5e / v6e / v7x).
_TM_CAP = 512                 # max batch rows per tile (keeps epilogue vreg-friendly)
_TK_CAP = 8192                # upper bound on the K tile
_TILE_VMEM_BUDGET = 40 << 20  # bytes reserved for tiles + residents
_VMEM_LIMIT_BYTES = 48 << 20  # scoped VMEM limit: > v5e's 16 MiB default, < v7x's 64 MiB


def prepare_params(params):
    """Pad + cast the static model parameters ONCE so the per-call forward does
    zero extra HBM passes over the weights."""
    w0, b0 = params["w0"], params["b0"]
    w1, b1 = params["w1"], params["b1"]
    w2, b2 = params["w2"], params["b2"]
    pe = params["pe"]

    Fin, D = w0.shape
    Fd = w2.shape[1]
    Dp = _round_up(D, 128)
    Fdp = _round_up(Fd, 128)
    Fin128 = _round_up(Fin, 128)

    # Largest K tile whose double-buffered f32 x-tile + bf16 w0-tile plus the
    # VMEM-resident tensors fit the tile budget (assuming worst-case TM = cap).
    fixed = (
        2 * _TM_CAP * Dp * 4            # pe tile (f32, double buffered)
        + 2 * _TM_CAP * Fdp * 4         # out tile (f32, double buffered)
        + _TM_CAP * Dp * 4              # f32 accumulator scratch
        + 2 * (Dp * Dp + Dp * Fdp) * 2  # resident w1 / w2 (bf16)
        + 2 * (2 * Dp + Fdp) * 4        # resident biases (f32)
    )
    per_tk = 2 * (_TM_CAP * 4 + Dp * 2)  # double-buffered x row (f32) + w0 row (bf16)
    tk_max = max(128, min(_TK_CAP,
                          ((_TILE_VMEM_BUDGET - fixed) // per_tk) // 128 * 128))
    nk = -(-Fin128 // tk_max)                  # number of K steps
    TK = _round_up(-(-Fin128 // nk), 128)      # minimal-padding TK <= tk_max
    Finp = TK * nk

    prepared = dict(
        w0=_pad_to(w0, (Finp, Dp)).astype(jnp.bfloat16),
        w1=_pad_to(w1, (Dp, Dp)).astype(jnp.bfloat16),
        w2=_pad_to(w2, (Dp, Fdp)).astype(jnp.bfloat16),
        b0=_pad_to(b0, (1, Dp)).astype(jnp.float32),
        b1=_pad_to(b1, (1, Dp)).astype(jnp.float32),
        b2=_pad_to(b2, (1, Fdp)).astype(jnp.float32),
        pe=_pad_to(pe, (pe.shape[0], Dp)).astype(jnp.float32),
    )
    meta = dict(Fin=Fin, Finp=Finp, D=D, Dp=Dp, Fd=Fd, Fdp=Fdp, TK=TK)
    return prepared, meta


def contrastive_model_pe_forward(x, frame_idxs, prepared, meta):
    """x: [B, C, H, W] float32, frame_idxs: [B] int32."""
    B = x.shape[0]
    x2d = x.reshape(B, -1).astype(jnp.float32)      # matches torch.flatten(x, 1)
    assert x2d.shape[1] == meta["Fin"]

    Finp, Dp, Fdp, TK = meta["Finp"], meta["Dp"], meta["Fdp"], meta["TK"]
    Fd = meta["Fd"]

    # TODO(synk): the per-row data-dependent PE gather stays in XLA glue; a
    #             BlockSpec pl.Element gather can only fetch one row per grid step.
    pe_rows = prepared["pe"][frame_idxs]

    # One batch tile for B <= _TM_CAP so W0 streams from HBM exactly once;
    # multiple of 16 keeps bf16 sublane packing unmasked.  For B >= 2*_TM_CAP
    # the "parallel" batch axis has >= 2 tiles and feeds both v7x TensorCores.
    TM = min(_round_up(max(B, 1), 16), _TM_CAP)
    Bp = _round_up(B, TM)

    x_p = _pad_to(x2d, (Bp, Finp))     # zero padding is numerically inert
    pe_p = _pad_to(pe_rows, (Bp, Dp))

    grid = (Bp // TM, Finp // TK)

    out = pl.pallas_call(
        _contrastive_kernel,
        out_shape=jax.ShapeDtypeStruct((Bp, Fdp), jnp.float32),
        grid_spec=pltpu.PrefetchScalarGridSpec(
            num_scalar_prefetch=0,
            grid=grid,
            in_specs=[
                pl.BlockSpec((TM, TK), lambda i, k: (i, k)),    # x tile (f32)
                pl.BlockSpec((TM, Dp), lambda i, k: (i, 0)),    # pe rows tile (f32)
                pl.BlockSpec((TK, Dp), lambda i, k: (k, 0)),    # w0 K-tile (bf16)
                pl.BlockSpec((1, Dp), lambda i, k: (0, 0)),     # b0 (resident)
                pl.BlockSpec((Dp, Dp), lambda i, k: (0, 0)),    # w1 (resident)
                pl.BlockSpec((1, Dp), lambda i, k: (0, 0)),     # b1 (resident)
                pl.BlockSpec((Dp, Fdp), lambda i, k: (0, 0)),   # w2 (resident)
                pl.BlockSpec((1, Fdp), lambda i, k: (0, 0)),    # b2 (resident)
            ],
            out_specs=pl.BlockSpec((TM, Fdp), lambda i, k: (i, 0)),
            scratch_shapes=[pltpu.VMEM((TM, Dp), jnp.float32)],
        ),
        compiler_params=pltpu.CompilerParams(
            dimension_semantics=("parallel", "arbitrary"),
            vmem_limit_bytes=_VMEM_LIMIT_BYTES,
        ),
    )(x_p, pe_p, prepared["w0"], prepared["b0"], prepared["w1"],
      prepared["b1"], prepared["w2"], prepared["b2"])

    return out[:B, :Fd]


# ----------------------------- parameter init / reference --------------------

def make_positional_encoding(d_model, max_len=5000):
    position = jnp.arange(max_len, dtype=jnp.float32)[:, None]
    div_term = jnp.exp(
        jnp.arange(0, d_model, 2, dtype=jnp.float32) * (-math.log(10000.0) / d_model)
    )
    pe = jnp.zeros((max_len, d_model), dtype=jnp.float32)
    pe = pe.at[:, 0::2].set(jnp.sin(position * div_term))
    pe = pe.at[:, 1::2].set(jnp.cos(position * div_term))
    return pe


def init_params(key, in_dim, backbone_dim, features_dim, max_len=5000):
    ks = jax.random.split(key, 6)

    def linear(kw, kb, fan_in, fan_out):
        bound = 1.0 / math.sqrt(fan_in)
        w = jax.random.uniform(kw, (fan_in, fan_out), jnp.float32, -bound, bound)
        b = jax.random.uniform(kb, (1, fan_out), jnp.float32, -bound, bound)
        return w, b

    w0, b0 = linear(ks[0], ks[1], in_dim, backbone_dim)        # synthetic backbone
    w1, b1 = linear(ks[2], ks[3], backbone_dim, backbone_dim)  # head layer 1
    w2, b2 = linear(ks[4], ks[5], backbone_dim, features_dim)  # head layer 2
    pe = make_positional_encoding(backbone_dim, max_len)
    return dict(w0=w0, b0=b0, w1=w1, b1=b1, w2=w2, b2=b2, pe=pe)


def reference_forward(x, frame_idxs, params):
    """Pure-JAX reference with the same bf16-in / f32-accumulate recipe."""
    x2d = x.reshape(x.shape[0], -1).astype(jnp.bfloat16)
    w0 = params["w0"].astype(jnp.bfloat16)
    w1 = params["w1"].astype(jnp.bfloat16)
    w2 = params["w2"].astype(jnp.bfloat16)

    h = jnp.dot(x2d, w0, preferred_element_type=jnp.float32) + params["b0"]
    h = jnp.maximum(h, 0.0) + params["pe"][frame_idxs]
    z = jnp.dot(h.astype(jnp.bfloat16), w1,
                preferred_element_type=jnp.float32) + params["b1"]
    z = jnp.maximum(z, 0.0)
    f = jnp.dot(z.astype(jnp.bfloat16), w2,
                preferred_element_type=jnp.float32) + params["b2"]
    ss = jnp.sum(f * f, axis=1, keepdims=True)
    return f * lax.rsqrt(jnp.maximum(ss, 1e-24))


# ----------------------------- demo / test ------------------------------------

if __name__ == "__main__":
    B, C, H, W = 8, 4, 16, 16          # NCHW input, flattened dim = 1024
    BACKBONE_DIM = 128
    FEATURES_DIM = 128
    MAX_LEN = 512

    key = jax.random.PRNGKey(0)
    kx, ki, kp = jax.random.split(key, 3)

    x = jax.random.normal(kx, (B, C, H, W), dtype=jnp.float32)
    frame_idxs = jax.random.randint(ki, (B,), 0, MAX_LEN, dtype=jnp.int32)
    params = init_params(kp, C * H * W, BACKBONE_DIM, FEATURES_DIM, max_len=MAX_LEN)

    # One-time pad + bf16 cast of the static parameters.
    prepared, meta = prepare_params(params)

    out = contrastive_model_pe_forward(x, frame_idxs, prepared, meta)
    out = jax.block_until_ready(out)

    ref = reference_forward(x, frame_idxs, params)
    assert out.shape == (B, FEATURES_DIM)
    assert jnp.allclose(out, ref, atol=2e-2, rtol=2e-2), "mismatch vs JAX reference"
    # Outputs are unit-norm rows.
    norms = jnp.sqrt(jnp.sum(out * out, axis=1))
    assert jnp.allclose(norms, jnp.ones_like(norms), atol=1e-3), "rows not unit-norm"

    print("KERNEL_OK")
</pallas_src>

<mosaic_0001>
module attributes {stable_mosaic.version = 11 : i64} {
  func.func @_contrastive_kernel(%arg0: i32, %arg1: i32, %arg2: memref<16x1024xf32, #tpu.memory_space<vmem>>, %arg3: memref<16x128xf32, #tpu.memory_space<vmem>>, %arg4: memref<1024x128xbf16, #tpu.memory_space<vmem>>, %arg5: memref<1x128xf32, #tpu.memory_space<vmem>>, %arg6: memref<128x128xbf16, #tpu.memory_space<vmem>>, %arg7: memref<1x128xf32, #tpu.memory_space<vmem>>, %arg8: memref<128x128xbf16, #tpu.memory_space<vmem>>, %arg9: memref<1x128xf32, #tpu.memory_space<vmem>>, %arg10: memref<16x128xf32, #tpu.memory_space<vmem>>, %arg11: memref<16x128xf32, #tpu.memory_space<vmem>>) attributes {dimension_semantics = [#tpu.dimension_semantics<parallel>, #tpu.dimension_semantics<arbitrary>], iteration_bounds = array<i64: 1, 1>, scalar_prefetch = 0 : i64, scratch_operands = 1 : i64, tpu.core_type = #tpu.core_type<tc>, window_params = [{transform_indices = @transform_0, window_bounds = array<i64: 16, 1024>}, {transform_indices = @transform_1, window_bounds = array<i64: 16, 128>}, {transform_indices = @transform_2, window_bounds = array<i64: 1024, 128>}, {pipeline_mode = #tpu.pipeline_mode<synchronous>, transform_indices = @transform_3, window_bounds = array<i64: 1, 128>}, {pipeline_mode = #tpu.pipeline_mode<synchronous>, transform_indices = @transform_4, window_bounds = array<i64: 128, 128>}, {pipeline_mode = #tpu.pipeline_mode<synchronous>, transform_indices = @transform_5, window_bounds = array<i64: 1, 128>}, {pipeline_mode = #tpu.pipeline_mode<synchronous>, transform_indices = @transform_6, window_bounds = array<i64: 128, 128>}, {pipeline_mode = #tpu.pipeline_mode<synchronous>, transform_indices = @transform_7, window_bounds = array<i64: 1, 128>}, {transform_indices = @transform_8, window_bounds = array<i64: 16, 128>}]} {
    %c0_i32 = arith.constant 0 : i32
    %0 = arith.cmpi eq, %arg1, %c0_i32 : i32
    %1 = arith.extui %0 : i1 to i32
    %c0_i32_0 = arith.constant 0 : i32
    %2 = arith.cmpi ne, %1, %c0_i32_0 : i32
    scf.if %2 {
      %cst_10 = arith.constant 0.000000e+00 : f32
      %13 = vector.broadcast %cst_10 : f32 to vector<16x128xf32>
      %c0_11 = arith.constant 0 : index
      %c0_12 = arith.constant 0 : index
      %14 = vector.load %arg11[%c0_11, %c0_12] : memref<16x128xf32, #tpu.memory_space<vmem>>, vector<16x128xf32>
      tpu.vector_store %arg11[%c0_11, %c0_12], %13 {strides = array<i32>} : memref<16x128xf32, #tpu.memory_space<vmem>>, vector<16x128xf32>,
    } else {
    }
    %c0 = arith.constant 0 : index
    %c0_1 = arith.constant 0 : index
    %3 = vector.load %arg11[%c0, %c0_1] : memref<16x128xf32, #tpu.memory_space<vmem>>, vector<16x128xf32>
    %c0_2 = arith.constant 0 : index
    %c0_3 = arith.constant 0 : index
    %4 = vector.load %arg2[%c0_2, %c0_3] : memref<16x1024xf32, #tpu.memory_space<vmem>>, vector<16x1024xf32>
    %5 = arith.truncf %4 : vector<16x1024xf32> to vector<16x1024xbf16>
    %c0_4 = arith.constant 0 : index
    %c0_5 = arith.constant 0 : index
    %6 = vector.load %arg4[%c0_4, %c0_5] : memref<1024x128xbf16, #tpu.memory_space<vmem>>, vector<1024x128xbf16>
    %cst = arith.constant dense<0.000000e+00> : vector<16x128xf32>
    %7 = tpu.matmul %5, %6, %cst {dimension_numbers = #tpu.dot_dimension_numbers<[1], [0], [0], [1], [0, 0, 1, 1], [], []>} : vector<16x1024xbf16>, vector<1024x128xbf16>, vector<16x128xf32> -> vector<16x128xf32>
    %8 = arith.addf %3, %7 : vector<16x128xf32>
    %c0_6 = arith.constant 0 : index
    %c0_7 = arith.constant 0 : index
    %9 = vector.load %arg11[%c0_6, %c0_7] : memref<16x128xf32, #tpu.memory_space<vmem>>, vector<16x128xf32>
    tpu.vector_store %arg11[%c0_6, %c0_7], %8 {strides = array<i32>} : memref<16x128xf32, #tpu.memory_space<vmem>>, vector<16x128xf32>,
    %c0_i32_8 = arith.constant 0 : i32
    %10 = arith.cmpi eq, %arg1, %c0_i32_8 : i32
    %11 = arith.extui %10 : i1 to i32
    %c0_i32_9 = arith.constant 0 : i32
    %12 = arith.cmpi ne, %11, %c0_i32_9 : i32
    scf.if %12 {
      %c0_10 = arith.constant 0 : index
      %c0_11 = arith.constant 0 : index
      %13 = vector.load %arg11[%c0_10, %c0_11] : memref<16x128xf32, #tpu.memory_space<vmem>>, vector<16x128xf32>
      %c0_12 = arith.constant 0 : index
      %c0_13 = arith.constant 0 : index
      %14 = vector.load %arg5[%c0_12, %c0_13] : memref<1x128xf32, #tpu.memory_space<vmem>>, vector<1x128xf32>
      %15 = vector.broadcast %14 : vector<1x128xf32> to vector<16x128xf32>
      %16 = arith.addf %13, %15 : vector<16x128xf32>
      %cst_14 = arith.constant 0.000000e+00 : f32
      %17 = vector.broadcast %cst_14 : f32 to vector<16x128xf32>
      %18 = arith.maximumf %16, %17 : vector<16x128xf32>
      %c0_15 = arith.constant 0 : index
      %c0_16 = arith.constant 0 : index
      %19 = vector.load %arg3[%c0_15, %c0_16] : memref<16x128xf32, #tpu.memory_space<vmem>>, vector<16x128xf32>
      %20 = arith.addf %18, %19 : vector<16x128xf32>
      %21 = arith.truncf %20 : vector<16x128xf32> to vector<16x128xbf16>
      %c0_17 = arith.constant 0 : index
      %c0_18 = arith.constant 0 : index
      %22 = vector.load %arg6[%c0_17, %c0_18] : memref<128x128xbf16, #tpu.memory_space<vmem>>, vector<128x128xbf16>
      %cst_19 = arith.constant dense<0.000000e+00> : vector<16x128xf32>
      %23 = tpu.matmul %21, %22, %cst_19 {dimension_numbers = #tpu.dot_dimension_numbers<[1], [0], [0], [1], [0, 0, 1, 1], [], []>} : vector<16x128xbf16>, vector<128x128xbf16>, vector<16x128xf32> -> vector<16x128xf32>
      %c0_20 = arith.constant 0 : index
      %c0_21 = arith.constant 0 : index
      %24 = vector.load %arg7[%c0_20, %c0_21] : memref<1x128xf32, #tpu.memory_space<vmem>>, vector<1x128xf32>
      %25 = vector.broadcast %24 : vector<1x128xf32> to vector<16x128xf32>
      %26 = arith.addf %23, %25 : vector<16x128xf32>
      %cst_22 = arith.constant 0.000000e+00 : f32
      %27 = vector.broadcast %cst_22 : f32 to vector<16x128xf32>
      %28 = arith.maximumf %26, %27 : vector<16x128xf32>
      %29 = arith.truncf %28 : vector<16x128xf32> to vector<16x128xbf16>
      %c0_23 = arith.constant 0 : index
      %c0_24 = arith.constant 0 : index
      %30 = vector.load %arg8[%c0_23, %c0_24] : memref<128x128xbf16, #tpu.memory_space<vmem>>, vector<128x128xbf16>
      %cst_25 = arith.constant dense<0.000000e+00> : vector<16x128xf32>
      %31 = tpu.matmul %29, %30, %cst_25 {dimension_numbers = #tpu.dot_dimension_numbers<[1], [0], [0], [1], [0, 0, 1, 1], [], []>} : vector<16x128xbf16>, vector<128x128xbf16>, vector<16x128xf32> -> vector<16x128xf32>
      %c0_26 = arith.constant 0 : index
      %c0_27 = arith.constant 0 : index
      %32 = vector.load %arg9[%c0_26, %c0_27] : memref<1x128xf32, #tpu.memory_space<vmem>>, vector<1x128xf32>
      %33 = vector.broadcast %32 : vector<1x128xf32> to vector<16x128xf32>
      %34 = arith.addf %31, %33 : vector<16x128xf32>
      %35 = arith.mulf %34, %34 : vector<16x128xf32>
      %cst_28 = arith.constant dense<0.000000e+00> : vector<16xf32>
      %36 = vector.multi_reduction <add>, %35, %cst_28 [1] : vector<16x128xf32> to vector<16xf32>
      %37 = vector.shape_cast %36 : vector<16xf32> to vector<16x1xf32>
      %cst_29 = arith.constant 1.000000e-24 : f32
      %38 = vector.broadcast %cst_29 : f32 to vector<16x1xf32>
      %39 = arith.maximumf %37, %38 : vector<16x1xf32>
      %40 = math.rsqrt %39 : vector<16x1xf32>
      %41 = vector.broadcast %40 : vector<16x1xf32> to vector<16x128xf32>
      %42 = arith.mulf %34, %41 : vector<16x128xf32>
      %c0_30 = arith.constant 0 : index
      %c0_31 = arith.constant 0 : index
      %43 = vector.load %arg10[%c0_30, %c0_31] : memref<16x128xf32, #tpu.memory_space<vmem>>, vector<16x128xf32>
      tpu.vector_store %arg10[%c0_30, %c0_31], %42 {strides = array<i32>} : memref<16x128xf32, #tpu.memory_space<vmem>>, vector<16x128xf32>,
    } else {
    }
    return
  }
  func.func @transform_0(%arg0: i32, %arg1: i32) -> (i32, i32) {
    %c0_i32 = arith.constant 0 : i32
    return %arg0, %arg1 : i32, i32
  }
  func.func @transform_1(%arg0: i32, %arg1: i32) -> (i32, i32) {
    %c0_i32 = arith.constant 0 : i32
    %c0_i32_0 = arith.constant 0 : i32
    return %arg0, %c0_i32 : i32, i32
  }
  func.func @transform_2(%arg0: i32, %arg1: i32) -> (i32, i32) {
    %c0_i32 = arith.constant 0 : i32
    %c0_i32_0 = arith.constant 0 : i32
    return %arg1, %c0_i32 : i32, i32
  }
  func.func @transform_3(%arg0: i32, %arg1: i32) -> (i32, i32) {
    %c0_i32 = arith.constant 0 : i32
    %c0_i32_0 = arith.constant 0 : i32
    %c0_i32_1 = arith.constant 0 : i32
    return %c0_i32, %c0_i32_0 : i32, i32
  }
  func.func @transform_4(%arg0: i32, %arg1: i32) -> (i32, i32) {
    %c0_i32 = arith.constant 0 : i32
    %c0_i32_0 = arith.constant 0 : i32
    %c0_i32_1 = arith.constant 0 : i32
    return %c0_i32, %c0_i32_0 : i32, i32
  }
  func.func @transform_5(%arg0: i32, %arg1: i32) -> (i32, i32) {
    %c0_i32 = arith.constant 0 : i32
    %c0_i32_0 = arith.constant 0 : i32
    %c0_i32_1 = arith.constant 0 : i32
    return %c0_i32, %c0_i32_0 : i32, i32
  }
  func.func @transform_6(%arg0: i32, %arg1: i32) -> (i32, i32) {
    %c0_i32 = arith.constant 0 : i32
    %c0_i32_0 = arith.constant 0 : i32
    %c0_i32_1 = arith.constant 0 : i32
    return %c0_i32, %c0_i32_0 : i32, i32
  }
  func.func @transform_7(%arg0: i32, %arg1: i32) -> (i32, i32) {
    %c0_i32 = arith.constant 0 : i32
    %c0_i32_0 = arith.constant 0 : i32
    %c0_i32_1 = arith.constant 0 : i32
    return %c0_i32, %c0_i32_0 : i32, i32
  }
  func.func @transform_8(%arg0: i32, %arg1: i32) -> (i32, i32) {
    %c0_i32 = arith.constant 0 : i32
    %c0_i32_0 = arith.constant 0 : i32
    return %arg0, %c0_i32 : i32, i32
  }
}

</mosaic_0001>

<bundles_post_ra>
// kernel: tpu_custom_call.1
= control target key start
LH: loop header
LB: loop body
LE: loop exit
PB: predicated region body
PF: predicated region fallthrough
CT: control target
= control target key end

     0   :  { %13 = vsyncpa [#allocation4], 0  ;;  %s1738_s0 = inlined_call_operand.hbm [shape: f32[16,1024], index: 0, kind: input, shape index: {}]   ;;  %s1739_s1 = inlined_call_operand.hbm [shape: f32[16,128], index: 1, kind: input, shape index: {}]   ;;  %s1740_s2 = inlined_call_operand.hbm [shape: bf16[1024,128], index: 2, kind: input, shape index: {}]   ;;  %s1741_s3 = inlined_call_operand.vmem [shape: f32[1,128], index: 3, kind: input, shape index: {}]   ;;  %s1742_s4 = inlined_call_operand.hbm [shape: bf16[128,128], index: 4, kind: input, shape index: {}]   ;;  %s1743_s5 = inlined_call_operand.vmem [shape: f32[1,128], index: 5, kind: input, shape index: {}]   ;;  %s1744_s6 = inlined_call_operand.hbm [shape: bf16[128,128], index: 6, kind: input, shape index: {}]   ;;  %s1745_s7 = inlined_call_operand.vmem [shape: f32[1,128], index: 7, kind: input, shape index: {}]   ;;  %s1746_s8 = inlined_call_operand.hbm [shape: f32[16,128], index: 8, kind: output, shape index: {}]  }
   0x1   :  { %14 = vsyncpa [#allocation7], 0 }
   0x2   :  { %15 = vsyncpa [#allocation10], 0 }
   0x3   :  { %16 = vsyncpa [#allocation5], 0  ;;  %s1558_s27 = smov [#allocation6]   ;;  %s1418_s9 = scalar_lea.hbm %s1739_s1, 256 }
   0x4   :  { %s34_s28 = sshll.u32 %s1558_s27, 4  ;;  %p1419_p0 = scmp.ne.s32.totalorder %s1739_s1, %s1418_s9  ;;  %s35_s28 = int_to_ptr.vmem [resolvable:$true] %s34_s28 }
   0x5   :  { %p1422_p1 = scmp.lt.u32.totalorder %s1418_s9, %s1739_s1 }
   0x7   :  { %p1424_p2 = pnand %p1422_p1, %p1419_p0 }
   0x9   :  { %1427 = shalt.err (!%p1424_p2)
}
   0xa   :  { %s1428_s14 = scalar_lea.vmem %s35_s28, 256  ;;  %p1433_p4 = scmp.lt.s32.totalorder %s35_s28, %s35_s28 }
   0xb   :  { %p1429_p3 = scmp.ne.s32.totalorder %s35_s28, %s1428_s14  ;;  %p1434_p5 = scmp.lt.s32.totalorder %s1428_s14, %s1428_s14 }
   0xd   :  { %p1435_p6 = por %p1434_p5, %p1433_p4 }
   0xf   :  { %p1436_p7 = pnand %p1435_p6, %p1429_p3 }
  0x11   :  { %1439 = shalt.err (!%p1436_p7)
}
  0x12   :  { %s1559_s15 = smov 128   ;;  %s1560_s16 = smov 8  }
  0x13   :  { %40 = dma.hbm_to_vmem [thread:$0]  %s1739_s1, 256, %s35_s28, [#allocation7], %s1559_s15, %s1559_s15, %s1560_s16  }
  0x14   :  { %s1561_s19 = smov [#allocation9]   ;;  %s1562_s21 = smov [#allocation3]  }
  0x15   :  { %s60_s20 = sshll.u32 %s1561_s19, 4  ;;  %s22_s22 = sshll.u32 %s1562_s21, 4  ;;  %s61_s20 = int_to_ptr.vmem [resolvable:$true] %s60_s20  ;;  %s23_s22 = int_to_ptr.vmem [resolvable:$true] %s22_s22 }
  0x16   :  { %s1440_s25 = scalar_lea.hbm %s1742_s4, 1024 }
  0x17   :  { %p1441_p8 = scmp.ne.s32.totalorder %s1742_s4, %s1440_s25  ;;  %p1444_p9 = scmp.lt.u32.totalorder %s1440_s25, %s1742_s4 }
  0x19   :  { %p1446_p10 = pnand %p1444_p9, %p1441_p8 }
  0x1b   :  { %1449 = shalt.err (!%p1446_p10)
}
  0x1c   :  { %s1450_s1 = scalar_lea.vmem %s61_s20, 1024  ;;  %p1455_p12 = scmp.lt.s32.totalorder %s61_s20, %s61_s20 }
  0x1d   :  { %p1451_p11 = scmp.ne.s32.totalorder %s61_s20, %s1450_s1  ;;  %p1456_p13 = scmp.lt.s32.totalorder %s1450_s1, %s1450_s1 }
  0x1f   :  { %p1457_p0 = por %p1456_p13, %p1455_p12 }
  0x21   :  { %p1458_p1 = pnand %p1457_p0, %p1451_p11 }
  0x23   :  { %1461 = shalt.err (!%p1458_p1)
}
  0x24   :  { %s1563_s28 = smov 64   ;;  %s1564_s9 = smov 4  }
  0x25   :  { %66 = dma.hbm_to_vmem [thread:$0]  %s1742_s4, 1024, %s61_s20, [#allocation10], %s1563_s28, %s1563_s28, %s1564_s9  }
  0x26   :  { %s1462_s14 = scalar_lea.hbm %s1738_s0, 2048 }
  0x27   :  { %p1463_p2 = scmp.ne.s32.totalorder %s1738_s0, %s1462_s14  ;;  %p1466_p3 = scmp.lt.u32.totalorder %s1462_s14, %s1738_s0 }
  0x29   :  { %p1468_p4 = pnand %p1466_p3, %p1463_p2 }
  0x2b   :  { %1471 = shalt.err (!%p1468_p4)
}
  0x2c   :  { %s1472_s23 = scalar_lea.vmem %s23_s22, 2048  ;;  %p1477_p6 = scmp.lt.s32.totalorder %s23_s22, %s23_s22 }
  0x2d   :  { %p1473_p5 = scmp.ne.s32.totalorder %s23_s22, %s1472_s23  ;;  %p1478_p7 = scmp.lt.s32.totalorder %s1472_s23, %s1472_s23 }
  0x2f   :  { %p1479_p8 = por %p1478_p7, %p1477_p6 }
  0x31   :  { %p1480_p9 = pnand %p1479_p8, %p1473_p5 }
  0x33   :  { %1483 = shalt.err (!%p1480_p9)
}
  0x34   :  { %s1565_s4 = smov 1024   ;;  %s1566_s25 = smov [#allocation8]  }
  0x35   :  { %28 = dma.hbm_to_vmem [thread:$0]  %s1738_s0, 2048, %s23_s22, [#allocation4], %s1565_s4, %s1565_s4, %s1563_s28  }
  0x36   :  { %s46_s26 = sshll.u32 %s1566_s25, 4  ;;  %s1567_s27 = smov [#allocation11]   ;;  %s47_s26 = int_to_ptr.vmem [resolvable:$true] %s46_s26 }
  0x37   :  { %s74_s29 = sshll.u32 %s1567_s27, 4  ;;  %s1484_s10 = scalar_lea.hbm %s1740_s2, 8192  ;;  %s1659_s29 = int_to_ptr.vmem [resolvable:$true] %s74_s29 }
  0x38   :  { %p1485_p10 = scmp.ne.s32.totalorder %s1740_s2, %s1484_s10  ;;  %p1488_p11 = scmp.lt.u32.totalorder %s1484_s10, %s1740_s2 }
  0x3a   :  { %p1490_p12 = pnand %p1488_p11, %p1485_p10 }
  0x3c   :  { %1493 = shalt.err (!%p1490_p12)
}
  0x3d   :  { %s1494_s0 = scalar_lea.vmem %s47_s26, 8192  ;;  %p1499_p0 = scmp.lt.s32.totalorder %s47_s26, %s47_s26 }
  0x3e   :  { %p1495_p13 = scmp.ne.s32.totalorder %s47_s26, %s1494_s0  ;;  %p1500_p1 = scmp.lt.s32.totalorder %s1494_s0, %s1494_s0 }
  0x40   :  { %p1501_p2 = por %p1500_p1, %p1499_p0 }
  0x42   :  { %p1502_p3 = pnand %p1501_p2, %p1495_p13 }
  0x44   :  { %1505 = shalt.err (!%p1502_p3)
}
  0x45   :  { %52 = dma.hbm_to_vmem [thread:$0]  %s1740_s2, 8192, %s47_s26, [#allocation7], %s1563_s28, %s1563_s28, %s1564_s9  }
  0x46   :  { %s1506_s21 = scalar_lea.hbm %s1744_s6, 1024 }
  0x47   :  { %p1507_p4 = scmp.ne.s32.totalorder %s1744_s6, %s1506_s21  ;;  %p1510_p5 = scmp.lt.u32.totalorder %s1506_s21, %s1744_s6 }
  0x49   :  { %p1512_p6 = pnand %p1510_p5, %p1507_p4 }
  0x4b   :  { %1515 = shalt.err (!%p1512_p6)
}
  0x4c   :  { %s1516_s25 = scalar_lea.vmem %s1659_s29, 1024  ;;  %p1521_p8 = scmp.lt.s32.totalorder %s1659_s29, %s1659_s29 }
  0x4d   :  { %p1517_p7 = scmp.ne.s32.totalorder %s1659_s29, %s1516_s25  ;;  %p1522_p9 = scmp.lt.s32.totalorder %s1516_s25, %s1516_s25 }
  0x4f   :  { %p1523_p10 = por %p1522_p9, %p1521_p8 }
  0x51   :  { %p1524_p11 = pnand %p1523_p10, %p1517_p7 }
  0x53   :  { %1527 = shalt.err (!%p1524_p11)
}
  0x54   :  { %80 = dma.hbm_to_vmem [thread:$0]  %s1744_s6, 1024, %s1659_s29, [#allocation10], %s1563_s28, %s1563_s28, %s1564_s9  }
  0x55   :  { %1550 = dma.done.wait [#allocation4], 2048  }
  0x56   :  { %1551 = vsyncadd [#allocation4], 4294965248 }
  0x57   :  { %1552 = dma.done.wait [#allocation7], 8448  }
  0x58   :  { %1553 = vsyncadd [#allocation7], 4294958848 }
  0x59   :  { %1554 = dma.done.wait [#allocation10], 2048  }
  0x5a   :  { %1555 = vsyncadd [#allocation10], 4294965248  ;;  %v1334_v0 = vld [vmem:[#allocation8 + $0x40] sm:$0xff]   ;;  %v1338_v4 = vld [vmem:[#allocation8 + $0x48] sm:$0xff]   ;;  %vm1569_vm0 = vmmov 0  }
  0x5b   :  { %v1335_v1 = vld [vmem:[#allocation8 + $0xc0] sm:$0xff]   ;;  %1175 = vmatprep.subr.bf16.mxu0 %v1334_v0  ;;  %v1339_v5 = vld [vmem:[#allocation8 + $0xc8] sm:$0xff]   ;;  %v1342_v8 = vld [vmem:[#allocation8 + $0x50] sm:$0xff]  }
  0x5c   :  { %v1336_v2 = vld [vmem:[#allocation8] sm:$0xff]   ;;  %1197 = vmatprep.subr.bf16.mxu1 %v1335_v1  ;;  %v1340_v6 = vld [vmem:[#allocation8 + $0x8] sm:$0xff]   ;;  %v1343_v9 = vld [vmem:[#allocation8 + $0xd0] sm:$0xff]  }
  0x5d   :  { %v1337_v3 = vld [vmem:[#allocation8 + $0x80] sm:$0xff]   ;;  %1176 = vmatpush3.bf16.msra.mxu0 %v1336_v2  ;;  %v1341_v7 = vld [vmem:[#allocation8 + $0x88] sm:$0xff]   ;;  %v1344_v10 = vld [vmem:[#allocation8 + $0x10] sm:$0xff]  }
  0x5e   :  { %1198 = vmatpush3.bf16.msra.mxu1 %v1337_v3  ;;  %1177 = vmatprep.subr.bf16.mxu0 %v1338_v4  ;;  %v1345_v11 = vld [vmem:[#allocation8 + $0x90] sm:$0xff]   ;;  %v1346_v12 = vld [vmem:[#allocation8 + $0x58] sm:$0xff]   ;;  %v1350_v16 = vld [vmem:[#allocation8 + $0x60] sm:$0xff]  }
  0x5f   :  { %1199 = vmatprep.subr.bf16.mxu1 %v1339_v5  ;;  %v1347_v13 = vld [vmem:[#allocation8 + $0xd8] sm:$0xff]   ;;  %v1351_v17 = vld [vmem:[#allocation8 + $0xe0] sm:$0xff]   ;;  %v1354_v20 = vld [vmem:[#allocation8 + $0x68] sm:$0xff]  }
  0x60   :  { %v1348_v14 = vld [vmem:[#allocation8 + $0x18] sm:$0xff]   ;;  %v1352_v18 = vld [vmem:[#allocation8 + $0x20] sm:$0xff]   ;;  %v1355_v21 = vld [vmem:[#allocation8 + $0xe8] sm:$0xff]  }
  0x61   :  { %1178 = vmatpush3.bf16.msra.mxu0 %v1340_v6  ;;  %v1349_v15 = vld [vmem:[#allocation8 + $0x98] sm:$0xff]   ;;  %v1353_v19 = vld [vmem:[#allocation8 + $0xa0] sm:$0xff]   ;;  %v1356_v22 = vld [vmem:[#allocation8 + $0x28] sm:$0xff]  }
  0x62   :  { %1200 = vmatpush3.bf16.msra.mxu1 %v1341_v7  ;;  %1179 = vmatprep.subr.bf16.mxu0 %v1342_v8  ;;  %v1357_v23 = vld [vmem:[#allocation8 + $0xa8] sm:$0xff]   ;;  %v1358_v24 = vld [vmem:[#allocation8 + $0x70] sm:$0xff]   ;;  %v1362_v28 = vld [vmem:[#allocation8 + $0x78] sm:$0xff]  }
  0x63   :  { %1201 = vmatprep.subr.bf16.mxu1 %v1343_v9  ;;  %v1359_v25 = vld [vmem:[#allocation8 + $0xf0] sm:$0xff]   ;;  %v1363_v29 = vld [vmem:[#allocation8 + $0xf8] sm:$0xff]   ;;  %v110_v34 = vld [vmem:[#allocation3 + $0x18] sm:$0xff] }
  0x64   :  { %v1360_v26 = vld [vmem:[#allocation8 + $0x30] sm:$0xff]   ;;  %v1364_v30 = vld [vmem:[#allocation8 + $0x38] sm:$0xff]   ;;  %v118_v36 = vld [vmem:[#allocation3 + $0x58] sm:$0xff] }
  0x65   :  { %1180 = vmatpush3.bf16.msra.mxu0 %v1344_v10  ;;  %v1361_v27 = vld [vmem:[#allocation8 + $0xb0] sm:$0xff]   ;;  %v1365_v31 = vld [vmem:[#allocation8 + $0xb8] sm:$0xff]   ;;  %v126_v39 = vpack.c.bf16 %v118_v36, %v110_v34  ;;  %v109_v41 = vld [vmem:[#allocation3 + $0x10] sm:$0xff] }
  0x66   :  { %1202 = vmatpush3.bf16.msra.mxu1 %v1345_v11  ;;  %1181 = vmatprep.subr.bf16.mxu0 %v1346_v12  ;;  %v108_v32 = vld [vmem:[#allocation3 + $0x8] sm:$0xff]  ;;  %v107_v37 = vld [vmem:[#allocation3] sm:$0xff]  ;;  %v117_v42 = vld [vmem:[#allocation3 + $0x50] sm:$0xff] }
  0x67   :  { %1203 = vmatprep.subr.bf16.mxu1 %v1347_v13  ;;  %v116_v33 = vld [vmem:[#allocation3 + $0x48] sm:$0xff]  ;;  %v115_v38 = vld [vmem:[#allocation3 + $0x40] sm:$0xff]  ;;  %v125_v43 = vpack.c.bf16 %v117_v42, %v109_v41  ;;  %v1366_v44 = vld [vmem:[#allocation8 + $0x140] sm:$0xff]   ;;  %716 = vmatprep.mubr.bf16.mxu1 %v126_v39 }
  0x68   :  { %v124_v35 = vpack.c.bf16 %v116_v33, %v108_v32  ;;  %v123_v40 = vpack.c.bf16 %v115_v38, %v107_v37  ;;  %v1367_v45 = vld [vmem:[#allocation8 + $0x1c0] sm:$0xff]   ;;  %v1370_v48 = vld [vmem:[#allocation8 + $0x148] sm:$0xff]   ;;  %v1374_v52 = vld [vmem:[#allocation8 + $0x150] sm:$0xff]  }
  0x69   :  { %1182 = vmatpush3.bf16.msra.mxu0 %v1348_v14  ;;  %v1368_v46 = vld [vmem:[#allocation8 + $0x100] sm:$0xff]   ;;  %v1371_v49 = vld [vmem:[#allocation8 + $0x1c8] sm:$0xff]   ;;  %v1375_v53 = vld [vmem:[#allocation8 + $0x1d0] sm:$0xff]  }
  0x6a   :  { %1204 = vmatpush3.bf16.msra.mxu1 %v1349_v15  ;;  %1183 = vmatprep.subr.bf16.mxu0 %v1350_v16  ;;  %v1369_v47 = vld [vmem:[#allocation8 + $0x180] sm:$0xff]   ;;  %v1372_v50 = vld [vmem:[#allocation8 + $0x108] sm:$0xff]   ;;  %v1376_v54 = vld [vmem:[#allocation8 + $0x110] sm:$0xff]  }
  0x6b   :  { %1205 = vmatprep.subr.bf16.mxu1 %v1351_v17  ;;  %675 = vmatprep.mubr.bf16.mxu0 %v124_v35  ;;  %v1373_v51 = vld [vmem:[#allocation8 + $0x188] sm:$0xff]   ;;  %v1377_v55 = vld [vmem:[#allocation8 + $0x190] sm:$0xff]   ;;  %v1378_v56 = vld [vmem:[#allocation8 + $0x158] sm:$0xff]  }
  0x6c   :  { %v1379_v57 = vld [vmem:[#allocation8 + $0x1d8] sm:$0xff]   ;;  %v1382_v60 = vld [vmem:[#allocation8 + $0x160] sm:$0xff]   ;;  %v1386_v0 = vld [vmem:[#allocation8 + $0x168] sm:$0xff]  }
  0x6d   :  { %1184 = vmatpush3.bf16.msra.mxu0 %v1352_v18  ;;  %v1380_v58 = vld [vmem:[#allocation8 + $0x118] sm:$0xff]   ;;  %v1383_v61 = vld [vmem:[#allocation8 + $0x1e0] sm:$0xff]   ;;  %v1387_v1 = vld [vmem:[#allocation8 + $0x1e8] sm:$0xff]  }
  0x6e   :  { %1206 = vmatpush3.bf16.msra.mxu1 %v1353_v19  ;;  %1185 = vmatprep.subr.bf16.mxu0 %v1354_v20  ;;  %v1381_v59 = vld [vmem:[#allocation8 + $0x198] sm:$0xff]   ;;  %v1384_v62 = vld [vmem:[#allocation8 + $0x120] sm:$0xff]   ;;  %v1388_v2 = vld [vmem:[#allocation8 + $0x128] sm:$0xff]  }
  0x6f   :  { %1207 = vmatprep.subr.bf16.mxu1 %v1355_v21  ;;  %v1385_v63 = vld [vmem:[#allocation8 + $0x1a0] sm:$0xff]   ;;  %v1389_v3 = vld [vmem:[#allocation8 + $0x1a8] sm:$0xff]   ;;  %v1390_v4 = vld [vmem:[#allocation8 + $0x170] sm:$0xff]  }
  0x70   :  { %v1391_v5 = vld [vmem:[#allocation8 + $0x1f0] sm:$0xff]   ;;  %v1394_v8 = vld [vmem:[#allocation8 + $0x178] sm:$0xff]   ;;  %v114_v14 = vld [vmem:[#allocation3 + $0x38] sm:$0xff] }
  0x71   :  { %1186 = vmatpush3.bf16.msra.mxu0 %v1356_v22  ;;  %v1392_v6 = vld [vmem:[#allocation8 + $0x130] sm:$0xff]   ;;  %v1395_v9 = vld [vmem:[#allocation8 + $0x1f8] sm:$0xff]   ;;  %v122_v15 = vld [vmem:[#allocation3 + $0x78] sm:$0xff] }
  0x72   :  { %1208 = vmatpush3.bf16.msra.mxu1 %v1357_v23  ;;  %1187 = vmatprep.subr.bf16.mxu0 %v1358_v24  ;;  %v1393_v7 = vld [vmem:[#allocation8 + $0x1b0] sm:$0xff]   ;;  %v1396_v10 = vld [vmem:[#allocation8 + $0x138] sm:$0xff]   ;;  %v130_v17 = vpack.c.bf16 %v122_v15, %v114_v14  ;;  %v113_v20 = vld [vmem:[#allocation3 + $0x30] sm:$0xff] }
  0x73   :  { %1209 = vmatprep.subr.bf16.mxu1 %v1359_v25  ;;  %v1397_v11 = vld [vmem:[#allocation8 + $0x1b8] sm:$0xff]   ;;  %v111_v18 = vld [vmem:[#allocation3 + $0x20] sm:$0xff]  ;;  %v121_v22 = vld [vmem:[#allocation3 + $0x70] sm:$0xff]  ;;  %v1568_v25 = vmov 0.0  }
  0x74   :  { %v112_v12 = vld [vmem:[#allocation3 + $0x28] sm:$0xff]  ;;  %v119_v19 = vld [vmem:[#allocation3 + $0x60] sm:$0xff]  ;;  %v129_v23 = vpack.c.bf16 %v121_v22, %v113_v20  ;;  %v1398_v24 = vld [vmem:[#allocation9] sm:$0xff]  }
  0x75   :  { %1188 = vmatpush3.bf16.msra.mxu0 %v1360_v26  ;;  %v120_v13 = vld [vmem:[#allocation3 + $0x68] sm:$0xff]  ;;  %v127_v21 = vpack.c.bf16 %v119_v19, %v111_v18  ;;  %v1399_v26 = vld [vmem:[#allocation9 + $0x8] sm:$0xff]   ;;  %v1406_v33 = vld [vmem:[#allocation11] sm:$0xff]  }
  0x76   :  { %1210 = vmatpush3.bf16.msra.mxu1 %v1361_v27  ;;  %1189 = vmatprep.subr.bf16.mxu0 %v1362_v28  ;;  %v128_v16 = vpack.c.bf16 %v120_v13, %v112_v12  ;;  %v1400_v27 = vld [vmem:[#allocation9 + $0x10] sm:$0xff]   ;;  %v1401_v28 = vld [vmem:[#allocation9 + $0x18] sm:$0xff]   ;;  %v1407_v34 = vld [vmem:[#allocation11 + $0x8] sm:$0xff]  }
  0x77   :  { %1211 = vmatprep.subr.bf16.mxu1 %v1363_v29  ;;  %v1402_v29 = vld [vmem:[#allocation9 + $0x20] sm:$0xff]   ;;  %v1405_v32 = vld [vmem:[#allocation9 + $0x38] sm:$0xff]   ;;  %v1408_v35 = vld [vmem:[#allocation11 + $0x10] sm:$0xff]  }
  0x78   :  { %v1409_v36 = vld [vmem:[#allocation11 + $0x18] sm:$0xff]   ;;  %v1410_v37 = vld [vmem:[#allocation11 + $0x20] sm:$0xff]   ;;  %v1411_v38 = vld [vmem:[#allocation11 + $0x28] sm:$0xff]  }
  0x79   :  { %1190 = vmatpush3.bf16.msra.mxu0 %v1364_v30  ;;  %v1403_v30 = vld [vmem:[#allocation9 + $0x28] sm:$0xff]   ;;  %v1412_v15 = vld [vmem:[#allocation11 + $0x30] sm:$0xff]  }
  0x7a   :  { %1212 = vmatpush3.bf16.msra.mxu1 %v1365_v31  ;;  %1219 = vmatprep.subr.bf16.mxu0 %v1366_v44  ;;  %v1404_v31 = vld [vmem:[#allocation9 + $0x30] sm:$0xff]  }
  0x7b   :  { %1241 = vmatprep.subr.bf16.mxu1 %v1367_v45 }
  0x7c   :  { %676 = vmatmul.mubr.bf16.vlgmr.msra.gmra.mrb[0].mxu0 %v123_v40 }
  0x7d   :  { %717 = vmatmul.mubr.bf16.vlgmr.msra.gmra.mrb[0].mxu1 %v125_v43  ;;  %1220 = vmatpush3.bf16.msra.mxu0 %v1368_v46 }
  0x7e   :  { %1242 = vmatpush3.bf16.msra.mxu1 %v1369_v47  ;;  %1221 = vmatprep.subr.bf16.mxu0 %v1370_v48 }
  0x7f   :  { %1243 = vmatprep.subr.bf16.mxu1 %v1371_v49  ;;  %757 = vmatprep.mubr.bf16.mxu0 %v128_v16  ;;  %v1413_v16 = vld [vmem:[#allocation11 + $0x38] sm:$0xff]  }
  0x80   :  { %798 = vmatprep.mubr.bf16.mxu1 %v130_v17  ;;  %v1157_v17 = vld [vmem:[%s1743_s5] ss:$0 sm:$0xff]  ;;  %s1570_s5 = smov [#allocation12]  }
  0x81   :  { %1222 = vmatpush3.bf16.msra.mxu0 %v1372_v50 }
  0x82   :  { %1244 = vmatpush3.bf16.msra.mxu1 %v1373_v51  ;;  %1223 = vmatprep.subr.bf16.mxu0 %v1374_v52 }
  0x83   :  { %1245 = vmatprep.subr.bf16.mxu1 %v1375_v53 }
  0x85   :  { %1224 = vmatpush3.bf16.msra.mxu0 %v1376_v54 }
  0x86   :  { %1246 = vmatpush3.bf16.msra.mxu1 %v1377_v55  ;;  %1225 = vmatprep.subr.bf16.mxu0 %v1378_v56 }
  0x87   :  { %1247 = vmatprep.subr.bf16.mxu1 %v1379_v57 }
  0x89   :  { %1226 = vmatpush3.bf16.msra.mxu0 %v1380_v58 }
  0x8a   :  { %1248 = vmatpush3.bf16.msra.mxu1 %v1381_v59  ;;  %1227 = vmatprep.subr.bf16.mxu0 %v1382_v60 }
  0x8b   :  { %1249 = vmatprep.subr.bf16.mxu1 %v1383_v61 }
  0x8d   :  { %1228 = vmatpush3.bf16.msra.mxu0 %v1384_v62 }
  0x8e   :  { %1250 = vmatpush3.bf16.msra.mxu1 %v1385_v63  ;;  %1229 = vmatprep.subr.bf16.mxu0 %v1386_v0 }
  0x8f   :  { %1251 = vmatprep.subr.bf16.mxu1 %v1387_v1  ;;  %v1156_v1 = vld [vmem:[%s1741_s3] ss:$0 sm:$0xff] }
  0x91   :  { %1230 = vmatpush3.bf16.msra.mxu0 %v1388_v2 }
  0x92   :  { %1252 = vmatpush3.bf16.msra.mxu1 %v1389_v3  ;;  %1231 = vmatprep.subr.bf16.mxu0 %v1390_v4 }
  0x93   :  { %1253 = vmatprep.subr.bf16.mxu1 %v1391_v5 }
  0x95   :  { %1232 = vmatpush3.bf16.msra.mxu0 %v1392_v6 }
  0x96   :  { %1254 = vmatpush3.bf16.msra.mxu1 %v1393_v7  ;;  %1233 = vmatprep.subr.bf16.mxu0 %v1394_v8 }
  0x97   :  { %1255 = vmatprep.subr.bf16.mxu1 %v1395_v9  ;;  %v827_v9 = vld [vmem:[#allocation6] sm:$0xff] }
  0x99   :  { %1234 = vmatpush3.bf16.msra.mxu0 %v1396_v10  ;;  %v828_v10 = vld [vmem:[#allocation6 + $0x8] sm:$0xff] }
  0x9a   :  { %1256 = vmatpush3.bf16.msra.mxu1 %v1397_v11  ;;  %1281 = vmatprep.subr.bf16.mxu0 %v1568_v25 }
  0x9b   :  { %1301 = vmatprep.subr.bf16.mxu1 %v1568_v25 }
  0x9c   :  { %758 = vmatmul.mubr.bf16.vlgmr.msra.gmra.mrb[4].mxu0 %v127_v21 }
  0x9d   :  { %799 = vmatmul.mubr.bf16.vlgmr.msra.gmra.mrb[4].mxu1 %v129_v23  ;;  %1282 = vmatpush3.bf16.msra.mxu0 %v1398_v24 }
  0x9e   :  { %1283 = vmatprep.subr.bf16.mxu0 %v1568_v25  ;;  %1297 = vmatprep.mubr.msk.bf16.mxu0 %vm1569_vm0, %v1568_v25 }
  0x9f   :  { %1317 = vmatprep.mubr.msk.bf16.mxu1 %vm1569_vm0, %v1568_v25  ;;  %1302 = vmatpush3.bf16.msra.mxu1 %v1406_v33 }
  0xa0   :  { %1303 = vmatprep.subr.bf16.mxu1 %v1568_v25 }
  0xa1   :  { %1284 = vmatpush3.bf16.msra.mxu0 %v1399_v26 }
  0xa2   :  { %1285 = vmatprep.subr.bf16.mxu0 %v1568_v25 }
  0xa3   :  { %1304 = vmatpush3.bf16.msra.mxu1 %v1407_v34 }
  0xa4   :  { %1305 = vmatprep.subr.bf16.mxu1 %v1568_v25 }
  0xa5   :  { %1286 = vmatpush3.bf16.msra.mxu0 %v1400_v27 }
  0xa6   :  { %1287 = vmatprep.subr.bf16.mxu0 %v1568_v25 }
  0xa7   :  { %1306 = vmatpush3.bf16.msra.mxu1 %v1408_v35 }
  0xa8   :  { %1307 = vmatprep.subr.bf16.mxu1 %v1568_v25 }
  0xa9   :  { %1288 = vmatpush3.bf16.msra.mxu0 %v1401_v28 }
  0xaa   :  { %1289 = vmatprep.subr.bf16.mxu0 %v1568_v25 }
  0xab   :  { %1308 = vmatpush3.bf16.msra.mxu1 %v1409_v36 }
  0xac   :  { %1309 = vmatprep.subr.bf16.mxu1 %v1568_v25 }
  0xad   :  { %1290 = vmatpush3.bf16.msra.mxu0 %v1402_v29 }
  0xae   :  { %1291 = vmatprep.subr.bf16.mxu0 %v1568_v25 }
  0xaf   :  { %1310 = vmatpush3.bf16.msra.mxu1 %v1410_v37 }
  0xb0   :  { %1311 = vmatprep.subr.bf16.mxu1 %v1568_v25 }
  0xb1   :  { %1292 = vmatpush3.bf16.msra.mxu0 %v1403_v30 }
  0xb2   :  { %1293 = vmatprep.subr.bf16.mxu0 %v1568_v25 }
  0xb3   :  { %1312 = vmatpush3.bf16.msra.mxu1 %v1411_v38 }
  0xb4   :  { %1313 = vmatprep.subr.bf16.mxu1 %v1568_v25 }
  0xb5   :  { %1294 = vmatpush3.bf16.msra.mxu0 %v1404_v31 }
  0xb6   :  { %1295 = vmatprep.subr.bf16.mxu0 %v1568_v25 }
  0xb7   :  { %1314 = vmatpush3.bf16.msra.mxu1 %v1412_v15 }
  0xb8   :  { %1315 = vmatprep.subr.bf16.mxu1 %v1568_v25  ;;  %v1166_v25 = vld [vmem:[%s1745_s7] ss:$0 sm:$0xff]  ;;  %s1078_s7 = sshll.u32 %s1570_s5, 4  ;;  %s1079_s7 = int_to_ptr.vmem [resolvable:$true] %s1078_s7 }
  0xb9   :  { %1296 = vmatpush3.bf16.msra.mxu0 %v1405_v32  ;;  %s1528_s30 = scalar_lea.vmem %s1079_s7, 256  ;;  %p1533_p13 = scmp.lt.s32.totalorder %s1079_s7, %s1079_s7 }
  0xba   :  { %p1529_p12 = scmp.ne.s32.totalorder %s1079_s7, %s1528_s30  ;;  %p1534_p0 = scmp.lt.s32.totalorder %s1528_s30, %s1528_s30 }
  0xbb   :  { %1316 = vmatpush3.bf16.msra.mxu1 %v1413_v16 }
  0xbc   :  { %p1535_p1 = por %p1534_p0, %p1533_p13 }
  0xbe   :  { %p1536_p2 = pnand %p1535_p1, %p1529_p12 }
 0x14f   :  { %v1191_v39 = vpop.f32.mrb[0].mxu0 }
 0x150   :  { %v1213_v40 = vpop.f32.mrb[0].mxu1  ;;  %v1192_v41 = vpop.f32.mrb[1].mxu0 }
 0x151   :  { %v1193_v42 = vadd.f32 %v1192_v41, %v1191_v39  ;;  %v1214_v43 = vpop.f32.mrb[1].mxu1  ;;  %v1194_v44 = vpop.f32.mrb[2].mxu0 }
 0x152   :  { %v1215_v45 = vadd.f32 %v1214_v43, %v1213_v40  ;;  %v1216_v46 = vpop.f32.mrb[2].mxu1  ;;  %v1195_v47 = vpop.f32.mrb[3].mxu0 }
 0x153   :  { %v1196_v48 = vadd.f32 %v1195_v47, %v1194_v44  ;;  %v1217_v49 = vpop.f32.mrb[3].mxu1 }
 0x154   :  { %v719_v50 = vadd.f32 %v1215_v45, %v1193_v42  ;;  %v1218_v51 = vadd.f32 %v1217_v49, %v1216_v46 }
 0x156   :  { %v722_v52 = vadd.f32 %v1218_v51, %v1196_v48 }
 0x16f   :  { %v1235_v53 = vpop.f32.mrb[4].mxu0 }
 0x170   :  { %v1257_v54 = vpop.f32.mrb[4].mxu1  ;;  %v1236_v55 = vpop.f32.mrb[5].mxu0 }
 0x171   :  { %v1237_v56 = vadd.f32 %v1236_v55, %v1235_v53  ;;  %v1258_v57 = vpop.f32.mrb[5].mxu1  ;;  %v1238_v58 = vpop.f32.mrb[6].mxu0 }
 0x172   :  { %v1259_v59 = vadd.f32 %v1258_v57, %v1257_v54  ;;  %v1260_v60 = vpop.f32.mrb[6].mxu1  ;;  %v1239_v61 = vpop.f32.mrb[7].mxu0 }
 0x173   :  { %v760_v62 = vadd.f32 %v1237_v56, %v719_v50  ;;  %v1240_v63 = vadd.f32 %v1239_v61, %v1238_v58  ;;  %v1261_v0 = vpop.f32.mrb[7].mxu1 }
 0x174   :  { %v1262_v2 = vadd.f32 %v1261_v0, %v1260_v60 }
 0x175   :  { %v801_v3 = vadd.f32 %v1259_v59, %v760_v62  ;;  %v763_v4 = vadd.f32 %v1240_v63, %v722_v52 }
 0x177   :  { %v823_v5 = vadd.f32 %v1156_v1, %v801_v3  ;;  %v804_v6 = vadd.f32 %v1262_v2, %v763_v4 }
 0x179   :  { %v825_v7 = vmax.f32 %v823_v5, 0.0  ;;  %v824_v8 = vadd.f32 %v1156_v1, %v804_v6 }
 0x17b   :  { %v826_v11 = vmax.f32 %v824_v8, 0.0  ;;  %v829_v12 = vadd.f32 %v827_v9, %v825_v7 }
 0x17d   :  { %v830_v13 = vadd.f32 %v828_v10, %v826_v11 }
 0x17f   :  { %v831_v14 = vpack.c.bf16 %v830_v13, %v829_v12 }
 0x181   :  { %1298 = vmatmul.mubr.bf16.vlgmr.msra.gmra.mrb[8].mxu0 %v831_v14 }
 0x254   :  { %v937_v18 = vpop.f32.mrb[8].mxu0 }
 0x255   :  { %v938_v19 = vadd.f32 %v1157_v17, %v937_v18  ;;  %v1299_v20 = vpop.f32.mrb[9].mxu0 }
 0x256   :  { %v940_v21 = vpop.f32.mrb[10].mxu0 }
 0x257   :  { %v941_v22 = vadd.f32 %v1157_v17, %v940_v21  ;;  %v1300_v23 = vpop.f32.mrb[11].mxu0  ;;  %v944_v24 = vmax.f32 %v938_v19, 0.0 }
 0x259   :  { %v945_v26 = vmax.f32 %v941_v22, 0.0 }
 0x25b   :  { %v946_v27 = vpack.c.bf16 %v945_v26, %v944_v24 }
 0x25d   :  { %1318 = vmatmul.mubr.bf16.vlgmr.msra.gmra.mrb[8].mxu1 %v946_v27 }
 0x330   :  { %v1052_v28 = vpop.f32.mrb[8].mxu1 }
 0x331   :  { %v1053_v29 = vadd.f32 %v1166_v25, %v1052_v28  ;;  %v1319_v30 = vpop.f32.mrb[9].mxu1 }
 0x332   :  { %v1055_v31 = vpop.f32.mrb[10].mxu1 }
 0x333   :  { %v1056_v32 = vadd.f32 %v1166_v25, %v1055_v31  ;;  %v1320_v33 = vpop.f32.mrb[11].mxu1  ;;  %v1059_v34 = vmul.f32 %v1053_v29, %v1053_v29 }
 0x335   :  { %1061 = vadd.xlane.f32.xlu0 %v1059_v34  ;;  %v1060_v35 = vmul.f32 %v1056_v32, %v1056_v32 }
 0x339   :  { %1063 = vadd.xlane.f32.xlu0 %v1060_v35 }
 0x3c2   :  { %v1062_v36 = vpop.xlane.xlu0 %1061 }
 0x3c3   :  { %v1065_v37 = vmax.f32 %v1062_v36, 1e-24 }
 0x3c5   :  { %1414 = vrsqrt.f32 %v1065_v37 }
 0x3c6   :  { %v1064_v38 = vpop.xlane.xlu0 %1063 }
 0x3c7   :  { %v1066_v39 = vmax.f32 %v1064_v38, 1e-24 }
 0x3c9   :  { %1416 = vrsqrt.f32 %v1066_v39 }
 0x3cf   :  { %v1415_v40 = vpop.eup %1414 }
 0x3d0   :  { %v1069_v41 = vmul.f32 %v1415_v40, %v1053_v29 }
 0x3d2   :  { %1071 = vst [vmem:[#allocation12] sm:$0xff] %v1069_v41 }
 0x3d3   :  { %v1417_v42 = vpop.eup %1416 }
 0x3d4   :  { %v1070_v43 = vmul.f32 %v1417_v42, %v1056_v32 }
 0x3d6   :  { %1072 = vst [vmem:[#allocation12 + $0x8] sm:$0xff] %v1070_v43 }
 0x3d7   :  { %1539 = shalt.err (!%p1536_p2)
}
 0x3d8   :  { %s1540_s11 = scalar_lea.hbm %s1746_s8, 256 }
 0x3d9   :  { %p1541_p3 = scmp.ne.s32.totalorder %s1746_s8, %s1540_s11  ;;  %p1544_p4 = scmp.lt.u32.totalorder %s1540_s11, %s1746_s8 }
 0x3db   :  { %p1546_p5 = pnand %p1544_p4, %p1541_p3 }
 0x3dd   :  { %1549 = shalt.err (!%p1546_p5)
}
 0x3de   :  { %1084 = dma.vmem_to_hbm [thread:$0]  %s1079_s7, 256, %s1746_s8, [#allocation5], %s1559_s15, %s1559_s15, %s1560_s16  }
 0x3df   :  { %1556 = dma.done.wait [#allocation5], 256  }
 0x3e0   :  { %1557 = vsyncadd [#allocation5], 4294967040 }
 0x3e1   :  { %1088 = vsyncpa [#allocation4], 1 }
 0x3e2   :  { %1089 = vsyncpa [#allocation7], 1 }
 0x3e3   :  { %1090 = vsyncpa [#allocation10], 1 }
 0x3e4   :  { %1091 = vsyncpa [#allocation5], 1 }

</bundles_post_ra>
